<compile_context>
chip_gen: v6e
topology: v6e:2x2x1
jax: 0.10.0
libtpu: 0.0.40
codegen_flags: <defaults>
</compile_context>

<pallas_src>
import jax
import jax.numpy as jnp
from jax.experimental import pallas as pl
from jax.experimental.pallas import tpu as pltpu


def _round_up(n: int, m: int) -> int:
    return ((n + m - 1) // m) * m


def vuln_model_kernel(xt_ref, w1_ref, b1_ref, w2_ref, b2_ref,
                      y_ref, ydiv_ref, mask_ref):
    xt = xt_ref[...]          # (D_in, TB)  f32, batch on lanes
    w1 = w1_ref[...]          # (D_hid, D_in)   PyTorch (out, in) layout
    b1 = b1_ref[...]          # (D_hid, 1)
    w2 = w2_ref[...]          # (D_out, D_hid)
    b2 = b2_ref[...]          # (D_out, 1)

    # Per-batch-row "contains a zero" mask: reduce over the feature (sublane)
    # axis.  Sum-of-f32 reduce is the most lowering-friendly form.
    zero_count = jnp.sum((xt == 0.0).astype(jnp.float32), axis=0, keepdims=True)
    mask_ref[...] = (zero_count > 0.0).astype(jnp.int32)          # (1, TB)

    def mlp(x):
        h = jnp.dot(w1, x, preferred_element_type=jnp.float32) + b1    # (D_hid, TB)
        h = jnp.maximum(h, 0.0)
        return jnp.dot(w2, h, preferred_element_type=jnp.float32) + b2  # (D_out, TB)

    # Branch 1: torch.any(x == 0) is False -> MLP on raw x.
    y_ref[...] = mlp(xt).astype(y_ref.dtype)
    # Branch 2: torch.any(x == 0) is True -> MLP on x / x (0/0 -> NaN, which
    # propagates through fc1/relu/fc2).  Computed unconditionally; the global
    # flag is only known after all tiles, so the (2, B) select happens outside.
    ydiv_ref[...] = mlp(xt / xt).astype(ydiv_ref.dtype)


def vuln_model_forward(x, w1, b1, w2, b2, *, tb_max=32768):
    """x: (B, 10) f32.  Weights in PyTorch layout: w1 (10, 10) = (out, in),
    b1 (10,), w2 (2, 10) = (out, in), b2 (2,).  Returns (B, 2) f32."""
    B, D_in = x.shape
    D_hid = w1.shape[0]
    D_out = w2.shape[0]

    # Batch tile on the lane axis: multiple of 128, capped at tb_max, and
    # small enough that B > 128 always yields >= 2 grid steps (v7x megacore).
    tb_cap = max(128, _round_up(tb_max, 128))
    TB = max(128, min(tb_cap, _round_up(pl.cdiv(B, 2), 128)))
    Bp = _round_up(B, TB)
    grid = (Bp // TB,)

    # Pad extra batch rows with ones (never zero, never NaN); sliced off below.
    if Bp != B:
        x = jnp.concatenate([x, jnp.ones((Bp - B, D_in), x.dtype)], axis=0)
    xt = x.T                                   # (D_in, Bp), feature-major
    b1c = b1.reshape(D_hid, 1)
    b2c = b2.reshape(D_out, 1)

    flops = 2 * 2 * Bp * (D_in * D_hid + D_hid * D_out)      # both branches
    bytes_accessed = 4 * Bp * (D_in + 2 * D_out + 1)

    y_t, ydiv_t, mask = pl.pallas_call(
        vuln_model_kernel,
        out_shape=(
            jax.ShapeDtypeStruct((D_out, Bp), jnp.float32),   # y^T, no-zero branch
            jax.ShapeDtypeStruct((D_out, Bp), jnp.float32),   # y^T, x/x branch
            jax.ShapeDtypeStruct((1, Bp), jnp.int32),         # per-row zero mask
        ),
        grid=grid,
        in_specs=[
            # x^T tiled along the batch/lane axis; double-buffered by Pallas.
            pl.BlockSpec((D_in, TB), lambda i: (0, i)),
            # Parameters: constant block index -> DMA'd once, stay VMEM-resident.
            pl.BlockSpec((D_hid, D_in), lambda i: (0, 0)),
            pl.BlockSpec((D_hid, 1), lambda i: (0, 0)),
            pl.BlockSpec((D_out, D_hid), lambda i: (0, 0)),
            pl.BlockSpec((D_out, 1), lambda i: (0, 0)),
        ],
        out_specs=(
            pl.BlockSpec((D_out, TB), lambda i: (0, i)),
            pl.BlockSpec((D_out, TB), lambda i: (0, i)),
            pl.BlockSpec((1, TB), lambda i: (0, i)),
        ),
        compiler_params=pltpu.CompilerParams(
            dimension_semantics=("parallel",),       # megacore sharding on v7x
            vmem_limit_bytes=32 * 1024 * 1024,       # v5e scoped default is 16 MiB
        ),
        cost_estimate=pl.CostEstimate(
            flops=flops, transcendentals=Bp * D_in, bytes_accessed=bytes_accessed),
    )(xt, w1, b1c, w2, b2c)

    # Resolve the global torch.any(x == 0) flag with a tiny (2, B) select.
    has_zero = jnp.any(mask[0, :B] != 0)
    y = jnp.where(has_zero, ydiv_t[:, :B], y_t[:, :B])
    return y.T                                  # (B, D_out)


def reference_forward(x, w1, b1, w2, b2):
    """Plain-JAX reference with exact PyTorch semantics (weights (out, in))."""
    has_zero = jnp.any(x == 0)
    x = jnp.where(has_zero, x / x, x)
    h = jnp.maximum(x @ w1.T + b1, 0.0)
    return h @ w2.T + b2


def _check(out, ref):
    assert out.shape == ref.shape, (out.shape, ref.shape)
    assert bool(jnp.all(jnp.isnan(out) == jnp.isnan(ref)))
    assert bool(jnp.allclose(out, ref, atol=1e-5, rtol=1e-5, equal_nan=True))


if __name__ == "__main__":
    key = jax.random.PRNGKey(0)
    kx, k1, k2, k3, k4, kx2 = jax.random.split(key, 6)

    # Deterministic parameters in PyTorch layout: fc1.weight (10,10), fc2.weight (2,10).
    w1 = jax.random.normal(k1, (10, 10), dtype=jnp.float32) * 0.1
    b1 = jax.random.normal(k2, (10,), dtype=jnp.float32) * 0.1
    w2 = jax.random.normal(k3, (2, 10), dtype=jnp.float32) * 0.1
    b2 = jax.random.normal(k4, (2,), dtype=jnp.float32) * 0.1

    # --- Small batch (module-consistent shape: (8, 10)), no zeros ---------------
    B = 8
    x = jax.random.normal(kx, (B, 10), dtype=jnp.float32)
    out = jax.block_until_ready(vuln_model_forward(x, w1, b1, w2, b2))
    _check(out, reference_forward(x, w1, b1, w2, b2))

    # --- Exercise the torch.any(x == 0) branch (0/0 -> NaN row, constant rows) --
    x_zero = x.at[0, 0].set(0.0)
    out_zero = jax.block_until_ready(vuln_model_forward(x_zero, w1, b1, w2, b2))
    _check(out_zero, reference_forward(x_zero, w1, b1, w2, b2))

    # --- Larger batch: multi-tile grid + batch padding + zero in a later tile ---
    B2 = 1030
    x2 = jax.random.normal(kx2, (B2, 10), dtype=jnp.float32)
    x2 = x2.at[777, 4].set(0.0)
    out2 = jax.block_until_ready(
        vuln_model_forward(x2, w1, b1, w2, b2, tb_max=512)   # grid of 3 tiles
    )
    _check(out2, reference_forward(x2, w1, b1, w2, b2))

    print("KERNEL_OK")
</pallas_src>

<mosaic_0001>
module attributes {stable_mosaic.version = 11 : i64} {
  func.func @vuln_model_kernel(%arg0: i32, %arg1: memref<10x128xf32, #tpu.memory_space<vmem>>, %arg2: memref<10x10xf32, #tpu.memory_space<vmem>>, %arg3: memref<10x1xf32, #tpu.memory_space<vmem>>, %arg4: memref<2x10xf32, #tpu.memory_space<vmem>>, %arg5: memref<2x1xf32, #tpu.memory_space<vmem>>, %arg6: memref<2x128xf32, #tpu.memory_space<vmem>>, %arg7: memref<2x128xf32, #tpu.memory_space<vmem>>, %arg8: memref<1x128xi32, #tpu.memory_space<vmem>>) attributes {dimension_semantics = [#tpu.dimension_semantics<parallel>], iteration_bounds = array<i64: 1>, scalar_prefetch = 0 : i64, scratch_operands = 0 : i64, tpu.core_type = #tpu.core_type<tc>, window_params = [{transform_indices = @transform_0, window_bounds = array<i64: 10, 128>}, {pipeline_mode = #tpu.pipeline_mode<synchronous>, transform_indices = @transform_1, window_bounds = array<i64: 10, 10>}, {pipeline_mode = #tpu.pipeline_mode<synchronous>, transform_indices = @transform_2, window_bounds = array<i64: 10, 1>}, {pipeline_mode = #tpu.pipeline_mode<synchronous>, transform_indices = @transform_3, window_bounds = array<i64: 2, 10>}, {pipeline_mode = #tpu.pipeline_mode<synchronous>, transform_indices = @transform_4, window_bounds = array<i64: 2, 1>}, {transform_indices = @transform_5, window_bounds = array<i64: 2, 128>}, {transform_indices = @transform_6, window_bounds = array<i64: 2, 128>}, {transform_indices = @transform_7, window_bounds = array<i64: 1, 128>}]} {
    %c0 = arith.constant 0 : index
    %c0_0 = arith.constant 0 : index
    %0 = vector.load %arg1[%c0, %c0_0] : memref<10x128xf32, #tpu.memory_space<vmem>>, vector<10x128xf32>
    %c0_1 = arith.constant 0 : index
    %c0_2 = arith.constant 0 : index
    %1 = vector.load %arg2[%c0_1, %c0_2] : memref<10x10xf32, #tpu.memory_space<vmem>>, vector<10x10xf32>
    %c0_3 = arith.constant 0 : index
    %c0_4 = arith.constant 0 : index
    %2 = vector.load %arg3[%c0_3, %c0_4] : memref<10x1xf32, #tpu.memory_space<vmem>>, vector<10x1xf32>
    %c0_5 = arith.constant 0 : index
    %c0_6 = arith.constant 0 : index
    %3 = vector.load %arg4[%c0_5, %c0_6] : memref<2x10xf32, #tpu.memory_space<vmem>>, vector<2x10xf32>
    %c0_7 = arith.constant 0 : index
    %c0_8 = arith.constant 0 : index
    %4 = vector.load %arg5[%c0_7, %c0_8] : memref<2x1xf32, #tpu.memory_space<vmem>>, vector<2x1xf32>
    %cst = arith.constant 0.000000e+00 : f32
    %5 = vector.broadcast %cst : f32 to vector<10x128xf32>
    %6 = arith.cmpf oeq, %0, %5 : vector<10x128xf32>
    %7 = arith.extui %6 : vector<10x128xi1> to vector<10x128xi32>
    %8 = arith.sitofp %7 : vector<10x128xi32> to vector<10x128xf32>
    %cst_9 = arith.constant dense<0.000000e+00> : vector<128xf32>
    %9 = vector.multi_reduction <add>, %8, %cst_9 [0] : vector<10x128xf32> to vector<128xf32>
    %10 = vector.shape_cast %9 : vector<128xf32> to vector<1x128xf32>
    %cst_10 = arith.constant 0.000000e+00 : f32
    %11 = vector.broadcast %cst_10 : f32 to vector<1x128xf32>
    %12 = arith.cmpf ogt, %10, %11 : vector<1x128xf32>
    %13 = arith.extui %12 : vector<1x128xi1> to vector<1x128xi32>
    %c0_11 = arith.constant 0 : index
    %c0_12 = arith.constant 0 : index
    %14 = vector.load %arg8[%c0_11, %c0_12] : memref<1x128xi32, #tpu.memory_space<vmem>>, vector<1x128xi32>
    tpu.vector_store %arg8[%c0_11, %c0_12], %13 {strides = array<i32>} : memref<1x128xi32, #tpu.memory_space<vmem>>, vector<1x128xi32>,
    %cst_13 = arith.constant dense<0.000000e+00> : vector<10x128xf32>
    %15 = tpu.matmul %1, %0, %cst_13 {dimension_numbers = #tpu.dot_dimension_numbers<[1], [0], [0], [1], [0, 0, 1, 1], [], []>} : vector<10x10xf32>, vector<10x128xf32>, vector<10x128xf32> -> vector<10x128xf32>
    %16 = vector.broadcast %2 : vector<10x1xf32> to vector<10x128xf32>
    %17 = arith.addf %15, %16 : vector<10x128xf32>
    %cst_14 = arith.constant 0.000000e+00 : f32
    %18 = vector.broadcast %cst_14 : f32 to vector<10x128xf32>
    %19 = arith.maximumf %17, %18 : vector<10x128xf32>
    %cst_15 = arith.constant dense<0.000000e+00> : vector<2x128xf32>
    %20 = tpu.matmul %3, %19, %cst_15 {dimension_numbers = #tpu.dot_dimension_numbers<[1], [0], [0], [1], [0, 0, 1, 1], [], []>} : vector<2x10xf32>, vector<10x128xf32>, vector<2x128xf32> -> vector<2x128xf32>
    %21 = vector.broadcast %4 : vector<2x1xf32> to vector<2x128xf32>
    %22 = arith.addf %20, %21 : vector<2x128xf32>
    %c0_16 = arith.constant 0 : index
    %c0_17 = arith.constant 0 : index
    %23 = vector.load %arg6[%c0_16, %c0_17] : memref<2x128xf32, #tpu.memory_space<vmem>>, vector<2x128xf32>
    tpu.vector_store %arg6[%c0_16, %c0_17], %22 {strides = array<i32>} : memref<2x128xf32, #tpu.memory_space<vmem>>, vector<2x128xf32>,
    %24 = arith.divf %0, %0 : vector<10x128xf32>
    %cst_18 = arith.constant dense<0.000000e+00> : vector<10x128xf32>
    %25 = tpu.matmul %1, %24, %cst_18 {dimension_numbers = #tpu.dot_dimension_numbers<[1], [0], [0], [1], [0, 0, 1, 1], [], []>} : vector<10x10xf32>, vector<10x128xf32>, vector<10x128xf32> -> vector<10x128xf32>
    %26 = vector.broadcast %2 : vector<10x1xf32> to vector<10x128xf32>
    %27 = arith.addf %25, %26 : vector<10x128xf32>
    %cst_19 = arith.constant 0.000000e+00 : f32
    %28 = vector.broadcast %cst_19 : f32 to vector<10x128xf32>
    %29 = arith.maximumf %27, %28 : vector<10x128xf32>
    %cst_20 = arith.constant dense<0.000000e+00> : vector<2x128xf32>
    %30 = tpu.matmul %3, %29, %cst_20 {dimension_numbers = #tpu.dot_dimension_numbers<[1], [0], [0], [1], [0, 0, 1, 1], [], []>} : vector<2x10xf32>, vector<10x128xf32>, vector<2x128xf32> -> vector<2x128xf32>
    %31 = vector.broadcast %4 : vector<2x1xf32> to vector<2x128xf32>
    %32 = arith.addf %30, %31 : vector<2x128xf32>
    %c0_21 = arith.constant 0 : index
    %c0_22 = arith.constant 0 : index
    %33 = vector.load %arg7[%c0_21, %c0_22] : memref<2x128xf32, #tpu.memory_space<vmem>>, vector<2x128xf32>
    tpu.vector_store %arg7[%c0_21, %c0_22], %32 {strides = array<i32>} : memref<2x128xf32, #tpu.memory_space<vmem>>, vector<2x128xf32>,
    return
  }
  func.func @transform_0(%arg0: i32) -> (i32, i32) {
    %c0_i32 = arith.constant 0 : i32
    %c0_i32_0 = arith.constant 0 : i32
    return %c0_i32, %arg0 : i32, i32
  }
  func.func @transform_1(%arg0: i32) -> (i32, i32) {
    %c0_i32 = arith.constant 0 : i32
    %c0_i32_0 = arith.constant 0 : i32
    %c0_i32_1 = arith.constant 0 : i32
    return %c0_i32, %c0_i32_0 : i32, i32
  }
  func.func @transform_2(%arg0: i32) -> (i32, i32) {
    %c0_i32 = arith.constant 0 : i32
    %c0_i32_0 = arith.constant 0 : i32
    %c0_i32_1 = arith.constant 0 : i32
    return %c0_i32, %c0_i32_0 : i32, i32
  }
  func.func @transform_3(%arg0: i32) -> (i32, i32) {
    %c0_i32 = arith.constant 0 : i32
    %c0_i32_0 = arith.constant 0 : i32
    %c0_i32_1 = arith.constant 0 : i32
    return %c0_i32, %c0_i32_0 : i32, i32
  }
  func.func @transform_4(%arg0: i32) -> (i32, i32) {
    %c0_i32 = arith.constant 0 : i32
    %c0_i32_0 = arith.constant 0 : i32
    %c0_i32_1 = arith.constant 0 : i32
    return %c0_i32, %c0_i32_0 : i32, i32
  }
  func.func @transform_5(%arg0: i32) -> (i32, i32) {
    %c0_i32 = arith.constant 0 : i32
    %c0_i32_0 = arith.constant 0 : i32
    return %c0_i32, %arg0 : i32, i32
  }
  func.func @transform_6(%arg0: i32) -> (i32, i32) {
    %c0_i32 = arith.constant 0 : i32
    %c0_i32_0 = arith.constant 0 : i32
    return %c0_i32, %arg0 : i32, i32
  }
  func.func @transform_7(%arg0: i32) -> (i32, i32) {
    %c0_i32 = arith.constant 0 : i32
    %c0_i32_0 = arith.constant 0 : i32
    return %c0_i32, %arg0 : i32, i32
  }
}

</mosaic_0001>

<bundles_post_ra>
// kernel: tpu_custom_call.1
= control target key start
LH: loop header
LB: loop body
LE: loop exit
PB: predicated region body
PF: predicated region fallthrough
CT: control target
= control target key end

     0   :  { %13 = vsyncpa [#allocation3], 0  ;;  %s701_s0 = inlined_call_operand.vmem [shape: f32[10,128], index: 0, kind: input, shape index: {}]   ;;  %s702_s1 = inlined_call_operand.hbm [shape: f32[10,10], index: 1, kind: input, shape index: {}]   ;;  %s703_s2 = inlined_call_operand.vmem [shape: f32[10,1], index: 2, kind: input, shape index: {}]   ;;  %s704_s3 = inlined_call_operand.vmem [shape: f32[2,10], index: 3, kind: input, shape index: {}]   ;;  %s705_s4 = inlined_call_operand.vmem [shape: f32[2,1], index: 4, kind: input, shape index: {}]   ;;  %s706_s5 = inlined_call_operand.hbm [shape: f32[2,128], index: 5, kind: output, shape index: {0}]   ;;  %s707_s6 = inlined_call_operand.hbm [shape: f32[2,128], index: 6, kind: output, shape index: {1}]   ;;  %s708_s7 = inlined_call_operand.hbm [shape: s32[1,128], index: 7, kind: output, shape index: {2}]  }
   0x1   :  { %14 = vsyncpa [#allocation4], 0 }
   0x2   :  { %15 = vsyncpa [#allocation7], 0  ;;  %s599_s24 = smov [#allocation2]  }
   0x3   :  { %s23_s25 = sshll.u32 %s599_s24, 4  ;;  %s24_s25 = int_to_ptr.vmem [resolvable:$true] %s23_s25 }
   0x4   :  { %s521_s26 = scalar_lea.vmem %s24_s25, 256  ;;  %p526_p1 = scmp.lt.s32.totalorder %s24_s25, %s24_s25 }
   0x5   :  { %p522_p0 = scmp.ne.s32.totalorder %s24_s25, %s521_s26  ;;  %p527_p2 = scmp.lt.s32.totalorder %s521_s26, %s521_s26 }
   0x7   :  { %p528_p3 = por %p527_p2, %p526_p1 }
   0x9   :  { %p529_p4 = pnand %p528_p3, %p522_p0 }
   0xb   :  { %532 = shalt.err (!%p529_p4)
}
   0xc   :  { %s600_s27 = smov 128   ;;  %s601_s28 = smov 8  }
   0xd   :  { %29 = dma.hbm_to_vmem [thread:$0]  %s702_s1, 256, %s24_s25, [#allocation3], %s600_s27, %s600_s27, %s601_s28  }
   0xe   :  { %593 = dma.done.wait [#allocation3], 256  }
   0xf   :  { %594 = vsyncadd [#allocation3], 4294967040  ;;  %v602_v0 = vmov 0   ;;  %v603_v1 = vmov 0.0   ;;  %vm53_vm0 = vcmask 1041408   ;;  %vm75_vm1 = vcmask 80896  }
  0x10   :  { %507 = vset.pattern.permute.xlu0 %v602_v0  ;;  %477 = vmatprep.subr.mxu1 %v603_v1  ;;  %v40_v2 = vld [vmem:[%s701_s0 + $0x8] sm:$0x3]  ;;  %v39_v3 = vld [vmem:[%s701_s0] sm:$0xff]  ;;  %vm604_vm5 = vmmov 0  }
  0x11   :  { %508 = vset.pattern.permute.xlu1 %v602_v0  ;;  %v41_v4 = vld [vmem:[#allocation2] sm:$0xff]  ;;  %vm48_vm2 = vcmp.eq.f32.partialorder %v40_v2, 0.0  ;;  %470 = vmatprep.subr.msk.mxu0 %vm53_vm0, %v40_v2  ;;  %509 = vrcp.f32 %v40_v2  ;;  %vm47_vm3 = vcmp.eq.f32.partialorder %v39_v3, 0.0  ;;  %v44_v5 = vld [vmem:[%s703_s2 + $0x8] sm:$0x3] }
  0x12   :  { %474 = vmatprep.mubr.msk.f32.mxu0 %vm75_vm1, %v41_v4  ;;  %v445_v6 = vsel %vm48_vm2, 1.0, %v603_v1  ;;  %471 = vmatpush3.msk.msra.mxu0 %vm53_vm0, %v40_v2  ;;  %511 = vrcp.f32 %v39_v3  ;;  %v42_v7 = vld [vmem:[#allocation2 + $0x8] sm:$0x3]  ;;  %v444_v8 = vsel %vm47_vm3, 1.0, %v603_v1  ;;  %v43_v10 = vld [vmem:[%s703_s2] sm:$0xff] }
  0x13   :  { %72 = vperm.xlu0 %507, %v44_v5   ;;  %472 = vmatprep.subr.mxu0 %v39_v3  ;;  %v54_v9 = vsel %vm53_vm0, %v445_v6, 0.0  ;;  %v46_v23 = vld [vmem:[%s705_s4] sm:$0x3] }
  0x14   :  { %473 = vmatpush3.msra.mxu0 %v39_v3  ;;  %v55_v11 = vadd.f32 %v444_v8, %v54_v9  ;;  %481 = vmatprep.mubr.msk.f32.mxu1 %vm604_vm5, %v603_v1  ;;  %v45_v32 = vld [vmem:[%s704_s3] sm:$0x3]  ;;  %s605_s3 = smov [#allocation5]  }
  0x15   :  { %475 = vmatmul.mubr.msk.f32.vlgmr.msra.gmra.mxu0 %vm75_vm1, %v42_v7  ;;  %164 = vperm.xlu1 %508, %v46_v23   ;;  %s408_s4 = sshll.u32 %s605_s3, 4  ;;  %s409_s4 = int_to_ptr.vmem [resolvable:$true] %s408_s4 }
  0x16   :  { %488 = vmatprep.mubr.msk.f32.mxu0 %vm75_vm1, %v41_v4  ;;  %v56_v12 = vrot.slane %v55_v11, 4  ;;  %s533_s17 = scalar_lea.vmem %s409_s4, 32  ;;  %p538_p6 = scmp.lt.s32.totalorder %s409_s4, %s409_s4 }
  0x17   :  { %67 = vperm.xlu0 %507, %v43_v10   ;;  %p534_p5 = scmp.ne.s32.totalorder %s409_s4, %s533_s17  ;;  %p539_p7 = scmp.lt.s32.totalorder %s533_s17, %s533_s17 }
  0x18   :  { %v57_v13 = vadd.f32 %v56_v12, %v55_v11 }
  0x19   :  { %p540_p8 = por %p539_p7, %p538_p6 }
  0x1a   :  { %v58_v14 = vrot.slane %v57_v13, 2 }
  0x1b   :  { %p541_p9 = pnand %p540_p8, %p534_p5 }
  0x1c   :  { %v59_v15 = vadd.f32 %v58_v14, %v57_v13 }
  0x1e   :  { %v510_v16 = vpop.eup %509  ;;  %v60_v17 = vrot.slane %v59_v15, 1 }
  0x1f   :  { %v512_v18 = vpop.eup %511  ;;  %v247_v19 = vmul.f32 %v510_v16, %v40_v2 }
  0x20   :  { %v245_v20 = vmul.f32 %v512_v18, %v39_v3  ;;  %v61_v21 = vadd.f32 %v60_v17, %v59_v15 }
  0x21   :  { %484 = vmatprep.subr.msk.mxu0 %vm53_vm0, %v247_v19 }
  0x22   :  { %485 = vmatpush3.msk.msra.mxu0 %vm53_vm0, %v247_v19  ;;  %vm62_vm4 = vcmp.gt.f32.partialorder %v61_v21, 0.0 }
  0x23   :  { %486 = vmatprep.subr.mxu0 %v245_v20  ;;  %v63_v22 = vsel %vm62_vm4, 1, %v602_v0 }
  0x24   :  { %487 = vmatpush3.msra.mxu0 %v245_v20  ;;  %64 = vst [vmem:[#allocation8] sm:$0x1] %v63_v22 }
  0x25   :  { %489 = vmatmul.mubr.msk.f32.vlgmr.msra.gmra.mxu0 %vm75_vm1, %v42_v7 }
  0x8e   :  { %v73_v24 = vpop.permute.xlu0 %72 }
  0x90   :  { %v165_v39 = vpop.permute.xlu1 %164 }
  0x92   :  { %v68_v26 = vpop.permute.xlu0 %67 }
  0xd5   :  { %v476_v25 = vpop.f32.mrf.mxu0 }
  0xd6   :  { %v157_v27 = vadd.f32 %v476_v25, %v73_v24 }
  0xd7   :  { %v151_v28 = vpop.f32.mrf.mxu0 }
  0xd8   :  { %v161_v29 = vmax.f32 %v157_v27, 0.0  ;;  %v152_v30 = vadd.f32 %v151_v28, %v68_v26 }
  0xda   :  { %v160_v31 = vmax.f32 %v152_v30, 0.0  ;;  %478 = vmatpush3.msk.msra.mxu1 %vm53_vm0, %v161_v29 }
  0xdb   :  { %479 = vmatprep.subr.mxu1 %v603_v1 }
  0xdc   :  { %480 = vmatpush3.msra.mxu1 %v160_v31 }
  0xdd   :  { %482 = vmatmul.mubr.msk.f32.vlgmr.msra.gmra.mxu1 %vm75_vm1, %v45_v32  ;;  %491 = vmatprep.subr.mxu1 %v603_v1 }
  0xde   :  { %495 = vmatprep.mubr.msk.f32.mxu1 %vm604_vm5, %v603_v1 }
  0xe5   :  { %v490_v33 = vpop.f32.mrf.mxu0 }
  0xe6   :  { %v323_v34 = vadd.f32 %v490_v33, %v73_v24 }
  0xe7   :  { %v317_v35 = vpop.f32.mrf.mxu0 }
  0xe8   :  { %v327_v36 = vmax.f32 %v323_v34, 0.0  ;;  %v318_v37 = vadd.f32 %v317_v35, %v68_v26 }
  0xea   :  { %v326_v38 = vmax.f32 %v318_v37, 0.0  ;;  %492 = vmatpush3.msk.msra.mxu1 %vm53_vm0, %v327_v36 }
  0xeb   :  { %493 = vmatprep.subr.mxu1 %v603_v1 }
  0xec   :  { %494 = vmatpush3.msra.mxu1 %v326_v38 }
  0xed   :  { %496 = vmatmul.mubr.msk.f32.vlgmr.msra.gmra.mxu1 %vm75_vm1, %v45_v32 }
 0x19d   :  { %v239_v40 = vpop.f32.mrf.mxu1 }
 0x19e   :  { %v240_v41 = vadd.f32 %v239_v40, %v165_v39 }
 0x19f   :  { %v483_v42 = vpop.f32.mrf.mxu1 }
 0x1a0   :  { %243 = vst [vmem:[#allocation5] sm:$0x3] %v240_v41 }
 0x1a1   :  { %544 = shalt.err (!%p541_p9)
}
 0x1a2   :  { %411 = dma.vmem_to_hbm [thread:$0]  %s409_s4, 32, %s706_s5, [#allocation4]  }
 0x1a3   :  { %s606_s20 = smov [#allocation6]   ;;  %s607_s22 = smov [#allocation8]  }
 0x1a4   :  { %s418_s21 = sshll.u32 %s606_s20, 4  ;;  %s428_s23 = sshll.u32 %s607_s22, 4  ;;  %s419_s21 = int_to_ptr.vmem [resolvable:$true] %s418_s21  ;;  %s429_s23 = int_to_ptr.vmem [resolvable:$true] %s428_s23 }
 0x1a5   :  { %s553_s24 = scalar_lea.vmem %s419_s21, 32  ;;  %p558_p11 = scmp.lt.s32.totalorder %s419_s21, %s419_s21 }
 0x1a6   :  { %p554_p10 = scmp.ne.s32.totalorder %s419_s21, %s553_s24  ;;  %p559_p12 = scmp.lt.s32.totalorder %s553_s24, %s553_s24 }
 0x1a8   :  { %p560_p13 = por %p559_p12, %p558_p11 }
 0x1aa   :  { %p561_p0 = pnand %p560_p13, %p554_p10 }
 0x1ad   :  { %v397_v43 = vpop.f32.mrf.mxu1 }
 0x1ae   :  { %v398_v44 = vadd.f32 %v397_v43, %v165_v39 }
 0x1af   :  { %v497_v45 = vpop.f32.mrf.mxu1 }
 0x1b0   :  { %401 = vst [vmem:[#allocation6] sm:$0x3] %v398_v44 }
 0x1b1   :  { %564 = shalt.err (!%p561_p0)
}
 0x1b2   :  { %421 = dma.vmem_to_hbm [thread:$0]  %s419_s21, 32, %s707_s6, [#allocation7]  }
 0x1b3   :  { %s573_s5 = scalar_lea.vmem %s429_s23, 16  ;;  %s577_s27 = scalar_lea.vmem %s429_s23, 32 }
 0x1b4   :  { %p574_p1 = scmp.ne.s32.totalorder %s429_s23, %s573_s5  ;;  %p578_p2 = scmp.lt.s32.totalorder %s429_s23, %s429_s23 }
 0x1b5   :  { %p579_p3 = scmp.lt.s32.totalorder %s577_s27, %s573_s5 }
 0x1b7   :  { %p580_p4 = por %p579_p3, %p578_p2 }
 0x1b9   :  { %p581_p5 = pnand %p580_p4, %p574_p1 }
 0x1bb   :  { %584 = shalt.err (!%p581_p5)
}
 0x1bc   :  { %431 = dma.vmem_to_hbm [thread:$0]  %s429_s23, 16, %s708_s7, [#allocation7]  }
 0x1bd   :  { %595 = dma.done.wait [#allocation4], 32  }
 0x1be   :  { %596 = vsyncadd [#allocation4], 4294967264 }
 0x1bf   :  { %597 = dma.done.wait [#allocation7], 48  }
 0x1c0   :  { %598 = vsyncadd [#allocation7], 4294967248 }
 0x1c1   :  { %441 = vsyncpa [#allocation3], 1 }
 0x1c2   :  { %442 = vsyncpa [#allocation4], 1 }
 0x1c3   :  { %443 = vsyncpa [#allocation7], 1 }

</bundles_post_ra>
